<compile_context>
chip_gen: v7x
topology: tpu7x:2x2x1
jax: 0.10.0
libtpu: 0.0.40
codegen_flags: <defaults>
</compile_context>

<pallas_src>
import jax
import jax.numpy as jnp
import numpy as np
from jax.experimental import pallas as pl
from jax.experimental.pallas import tpu as pltpu


_LANES = 128
_SUBLANES = 8
_ROW_TILE_TARGET = 512                       # sublane axis (B*C rows)
_HW_TILE_TARGET = 4096                       # lane axis (H*W)
_FUSED_SLAB_BYTES_MAX = 10 * 1024 * 1024     # f32-equivalent bytes per (C, HW) slab
_VMEM_LIMIT_BYTES = 48 * 1024 * 1024         # <= v7x 64 MiB physical, fine on v5e/v6e


def _pick_tile(dim, unit, target):
    """Tile size along one axis.

    dim <= target  -> the full dimension (always a legal block size, and small).
    dim  > target  -> a multiple of `unit` <= target; prefers an exact divisor
                      >= target//2, otherwise accepts a ragged last block
                      (kernels mask it / Pallas discards out-of-bounds writes).
    Never returns a block larger than the target when dim exceeds it."""
    if dim <= target:
        return dim
    best = max(unit, (target // unit) * unit)
    t = best
    while t >= max(unit, best // 2):
        if dim % t == 0:
            return t
        t -= unit
    return best


# ----------------------------------------------------------------------------
# Fused single-pass kernel (one batch's (C, HW) slab resident in VMEM).
# ----------------------------------------------------------------------------
def _make_fused_kernel(inv_hw):
    """Pool -> shared MLP -> sigmoid -> scale for one batch, no reshapes.

    The MLP runs in 'channels on sublanes' orientation on a (C, 2) matrix
    whose two lane columns are the max- and avg-pooled channel vectors, so the
    pooled (C, 1) columns feed the matmuls directly."""
    def kernel(x_ref, w1t_ref, b1_ref, w2t_ref, b2_ref, o_ref):
        xf = x_ref[...].astype(jnp.float32)                        # (C, HW)
        maxv = jnp.max(xf, axis=-1, keepdims=True)                 # (C, 1)
        avgv = jnp.sum(xf, axis=-1, keepdims=True) * inv_hw        # (C, 1)

        c = xf.shape[0]
        col = jax.lax.broadcasted_iota(jnp.int32, (c, 2), 1)
        p = jnp.where(col == 0, maxv, avgv)                        # (C, 2) = [max | avg]

        h = jnp.dot(w1t_ref[...], p,
                    preferred_element_type=jnp.float32) + b1_ref[...]
        h = jnp.maximum(h, 0.0)                                    # (C//r, 2)
        y = jnp.dot(w2t_ref[...], h,
                    preferred_element_type=jnp.float32) + b2_ref[...]   # (C, 2)
        # att = sigmoid(mlp(max) + mlp(avg)); the branches are y's two columns.
        att = jax.nn.sigmoid(jnp.sum(y, axis=-1, keepdims=True))   # (C, 1)

        o_ref[...] = (xf * att).astype(o_ref.dtype)
    return kernel


# ----------------------------------------------------------------------------
# Multi-pass fallback kernels.
# ----------------------------------------------------------------------------
def _make_pool_kernel(hw, hw_tile, row_tile, n_hw):
    """Per-row max / sum over the spatial (lane) axis.

    Single spatial tile: direct keepdims reductions.  Multiple spatial tiles:
    per-lane partials kept in a (row_tile, 128) VMEM scratch updated with pure
    VALU ops; the cross-lane XLU reduce and the (row_tile, 1) store happen
    only on the last spatial step of each row group.  The ragged last tile (if
    any) is masked with an iota compare against the true extent."""
    if n_hw == 1:
        def kernel(x_ref, max_ref, sum_ref):
            xf = x_ref[...].astype(jnp.float32)
            max_ref[...] = jnp.max(xf, axis=-1, keepdims=True)
            sum_ref[...] = jnp.sum(xf, axis=-1, keepdims=True)
        return kernel, []

    assert hw_tile % _LANES == 0, "spatial tiles above the target are lane-aligned"
    n_chunks = hw_tile // _LANES
    ragged = (hw % hw_tile) != 0

    def kernel(x_ref, max_ref, sum_ref, pmax_ref, psum_ref):
        t = pl.program_id(1)

        @pl.when(t == 0)
        def _():
            pmax_ref[...] = jnp.full(pmax_ref.shape, -jnp.inf, jnp.float32)
            psum_ref[...] = jnp.zeros(psum_ref.shape, jnp.float32)

        m = pmax_ref[...]
        s = psum_ref[...]
        if ragged:
            base = t * hw_tile
        for i in range(n_chunks):                       # static, VALU-only updates
            c = x_ref[:, i * _LANES:(i + 1) * _LANES].astype(jnp.float32)
            if ragged:                                  # mask the ragged last tile
                lane = jax.lax.broadcasted_iota(jnp.int32, c.shape, 1)
                valid = (base + i * _LANES + lane) < hw
                m = jnp.maximum(m, jnp.where(valid, c, -jnp.inf))
                s = s + jnp.where(valid, c, 0.0)
            else:
                m = jnp.maximum(m, c)
                s = s + c
        pmax_ref[...] = m
        psum_ref[...] = s

        @pl.when(t == pl.num_programs(1) - 1)
        def _():
            max_ref[...] = jnp.max(pmax_ref[...], axis=-1, keepdims=True)
            sum_ref[...] = jnp.sum(psum_ref[...], axis=-1, keepdims=True)

    scratch = [pltpu.VMEM((row_tile, _LANES), jnp.float32),
               pltpu.VMEM((row_tile, _LANES), jnp.float32)]
    return kernel, scratch


def _scale_kernel(x_ref, att_ref, o_ref):
    """o = x * att, broadcasting the per-row attention across the lane axis."""
    o_ref[...] = (x_ref[...].astype(jnp.float32) * att_ref[...]).astype(o_ref.dtype)


# ----------------------------------------------------------------------------
# Forward wrapper.
# ----------------------------------------------------------------------------
def cam_forward(x_nchw, w1, b1, w2, b2, *, donate_x=False, force_multipass=False,
                row_tile_target=_ROW_TILE_TARGET, hw_tile_target=_HW_TILE_TARGET):
    """CAM forward.  x_nchw: (B, C, H, W) -> same shape/dtype.

    w1: (C, C//r), b1: (C//r,), w2: (C//r, C), b2: (C,)   (row-vector matmul
    layout, i.e. the transpose of torch.nn.Linear.weight).  Pooling, the MLP
    and the attention are computed in float32 regardless of x's dtype."""
    B, C, H, W = x_nchw.shape
    HW = H * W
    Cr = w1.shape[1]

    w1f = jnp.asarray(w1, jnp.float32)
    b1f = jnp.asarray(b1, jnp.float32)
    w2f = jnp.asarray(w2, jnp.float32)
    b2f = jnp.asarray(b2, jnp.float32)

    # ---------- fused single-pass path: read x once, write out once ----------
    slab_f32_bytes = C * HW * 4   # the kernel holds an f32 view of the slab
    if (not force_multipass) and slab_f32_bytes <= _FUSED_SLAB_BYTES_MAX:
        x3 = x_nchw.reshape(B, C, HW)
        out3 = pl.pallas_call(
            _make_fused_kernel(1.0 / float(HW)),
            out_shape=jax.ShapeDtypeStruct((B, C, HW), x_nchw.dtype),
            grid=(B,),
            in_specs=[pl.BlockSpec((None, C, HW), lambda b: (b, 0, 0)),
                      pl.BlockSpec((Cr, C), lambda b: (0, 0)),
                      pl.BlockSpec((Cr, 1), lambda b: (0, 0)),
                      pl.BlockSpec((C, Cr), lambda b: (0, 0)),
                      pl.BlockSpec((C, 1), lambda b: (0, 0))],
            out_specs=pl.BlockSpec((None, C, HW), lambda b: (b, 0, 0)),
            compiler_params=pltpu.CompilerParams(
                dimension_semantics=("parallel",),
                vmem_limit_bytes=_VMEM_LIMIT_BYTES),
            input_output_aliases=({0: 0} if donate_x else {}),
        )(x3, w1f.T, b1f.reshape(Cr, 1), w2f.T, b2f.reshape(C, 1))
        return out3.reshape(B, C, H, W)

    # ---------- multi-pass fallback: pool -> (plain-JAX) MLP -> scale --------
    BC = B * C
    x2 = x_nchw.reshape(BC, HW)
    itemsize = np.dtype(x_nchw.dtype).itemsize
    row_unit = max(_SUBLANES, 32 // itemsize)          # 8 for f32, 16 for bf16
    row_tile = _pick_tile(BC, row_unit, row_tile_target)
    hw_tile = _pick_tile(HW, _LANES, hw_tile_target)
    n_rows = pl.cdiv(BC, row_tile)
    n_hw = pl.cdiv(HW, hw_tile)

    pool_kernel, pool_scratch = _make_pool_kernel(HW, hw_tile, row_tile, n_hw)
    maxv, sumv = pl.pallas_call(
        pool_kernel,
        out_shape=(jax.ShapeDtypeStruct((BC, 1), jnp.float32),
                   jax.ShapeDtypeStruct((BC, 1), jnp.float32)),
        grid=(n_rows, n_hw),
        in_specs=[pl.BlockSpec((row_tile, hw_tile), lambda g, t: (g, t))],
        out_specs=(pl.BlockSpec((row_tile, 1), lambda g, t: (g, 0)),
                   pl.BlockSpec((row_tile, 1), lambda g, t: (g, 0))),
        scratch_shapes=pool_scratch,
        compiler_params=pltpu.CompilerParams(
            dimension_semantics=("parallel", "arbitrary"),
            vmem_limit_bytes=_VMEM_LIMIT_BYTES),
    )(x2)

    # Tiny shared MLP + sigmoid in plain JAX: at (2B, C) x (C, C/r) sizes the
    # MXU buys nothing and a dedicated pallas_call just adds launch latency
    # plus an HBM round-trip for pooled/att.
    mx = maxv.reshape(B, C)
    av = (sumv * jnp.float32(1.0 / HW)).reshape(B, C)
    p = jnp.concatenate([mx, av], axis=0)                      # (2B, C)
    h = jnp.maximum(p @ w1f + b1f, 0.0)
    y = h @ w2f + b2f
    att2 = jax.nn.sigmoid(y[:B] + y[B:]).reshape(BC, 1)        # (BC, 1) f32

    out2 = pl.pallas_call(
        _scale_kernel,
        out_shape=jax.ShapeDtypeStruct((BC, HW), x_nchw.dtype),
        grid=(n_rows, n_hw),
        in_specs=[pl.BlockSpec((row_tile, hw_tile), lambda g, t: (g, t)),
                  pl.BlockSpec((row_tile, 1), lambda g, t: (g, 0))],
        out_specs=pl.BlockSpec((row_tile, hw_tile), lambda g, t: (g, t)),
        compiler_params=pltpu.CompilerParams(
            dimension_semantics=("parallel", "parallel"),
            vmem_limit_bytes=_VMEM_LIMIT_BYTES),
        input_output_aliases=({0: 0} if donate_x else {}),
    )(x2, att2)
    return out2.reshape(B, C, H, W)


def cam_reference(x_nchw, w1, b1, w2, b2):
    """Pure-JAX reference mirroring the PyTorch forward."""
    mx = jnp.max(x_nchw, axis=(2, 3))
    av = jnp.mean(x_nchw, axis=(2, 3))

    def mlp(v):
        return jnp.maximum(v @ w1 + b1, 0.0) @ w2 + b2

    att = jax.nn.sigmoid(mlp(mx) + mlp(av))
    return x_nchw * att[:, :, None, None]


if __name__ == "__main__":
    B, C, H, W = 2, 4, 16, 16
    r = 2
    Cr = C // r

    key = jax.random.PRNGKey(0)
    kx, kw1, kb1, kw2, kb2 = jax.random.split(key, 5)

    x = jax.random.normal(kx, (B, C, H, W), dtype=jnp.float32)
    # nn.Linear(C, C//r) and nn.Linear(C//r, C) weights, stored transposed for
    # row-vector matmul (i.e. torch weight.T).
    w1 = jax.random.normal(kw1, (C, Cr), dtype=jnp.float32) * 0.5
    b1 = jax.random.normal(kb1, (Cr,), dtype=jnp.float32) * 0.1
    w2 = jax.random.normal(kw2, (Cr, C), dtype=jnp.float32) * 0.5
    b2 = jax.random.normal(kb2, (C,), dtype=jnp.float32) * 0.1

    ref = cam_reference(x, w1, b1, w2, b2)

    # 1) fused single-pass path (default for small/medium feature maps).
    out = jax.block_until_ready(cam_forward(x, w1, b1, w2, b2))
    np.testing.assert_allclose(np.asarray(out), np.asarray(ref),
                               rtol=1e-5, atol=1e-5)

    # 2) multi-pass streaming path (used when the per-batch slab exceeds the
    #    VMEM budget) checked at the same shape.
    out_mp = jax.block_until_ready(
        cam_forward(x, w1, b1, w2, b2, force_multipass=True))
    np.testing.assert_allclose(np.asarray(out_mp), np.asarray(ref),
                               rtol=1e-5, atol=1e-5)

    # 3) multi-pass with a ragged spatial edge: exercises the masked, chunked
    #    per-lane pool accumulation and partial output blocks.
    H2, W2 = 20, 20
    x_rag = jax.random.normal(kx, (B, C, H2, W2), dtype=jnp.float32)
    ref_rag = cam_reference(x_rag, w1, b1, w2, b2)
    out_rag = jax.block_until_ready(
        cam_forward(x_rag, w1, b1, w2, b2,
                    force_multipass=True, hw_tile_target=128))
    np.testing.assert_allclose(np.asarray(out_rag), np.asarray(ref_rag),
                               rtol=1e-5, atol=1e-5)

    print("KERNEL_OK")
</pallas_src>

<mosaic_0001>
module attributes {stable_mosaic.version = 11 : i64} {
  func.func @kernel(%arg0: i32, %arg1: memref<1x4x256xf32, #tpu.memory_space<vmem>>, %arg2: memref<2x4xf32, #tpu.memory_space<vmem>>, %arg3: memref<2x1xf32, #tpu.memory_space<vmem>>, %arg4: memref<4x2xf32, #tpu.memory_space<vmem>>, %arg5: memref<4x1xf32, #tpu.memory_space<vmem>>, %arg6: memref<1x4x256xf32, #tpu.memory_space<vmem>>) attributes {dimension_semantics = [#tpu.dimension_semantics<parallel>], iteration_bounds = array<i64: 2>, scalar_prefetch = 0 : i64, scratch_operands = 0 : i64, tpu.core_type = #tpu.core_type<tc>, window_params = [{transform_indices = @transform_0, window_bounds = array<i64: 1, 4, 256>}, {pipeline_mode = #tpu.pipeline_mode<synchronous>, transform_indices = @transform_1, window_bounds = array<i64: 2, 4>}, {pipeline_mode = #tpu.pipeline_mode<synchronous>, transform_indices = @transform_2, window_bounds = array<i64: 2, 1>}, {pipeline_mode = #tpu.pipeline_mode<synchronous>, transform_indices = @transform_3, window_bounds = array<i64: 4, 2>}, {pipeline_mode = #tpu.pipeline_mode<synchronous>, transform_indices = @transform_4, window_bounds = array<i64: 4, 1>}, {transform_indices = @transform_5, window_bounds = array<i64: 1, 4, 256>}]} {
    %c0 = arith.constant 0 : index
    %c0_0 = arith.constant 0 : index
    %c0_1 = arith.constant 0 : index
    %0 = vector.load %arg1[%c0, %c0_0, %c0_1] : memref<1x4x256xf32, #tpu.memory_space<vmem>>, vector<1x4x256xf32>
    %1 = vector.shape_cast %0 : vector<1x4x256xf32> to vector<4x256xf32>
    %cst = arith.constant dense<0xFF800000> : vector<4xf32>
    %2 = vector.multi_reduction <maximumf>, %1, %cst [1] : vector<4x256xf32> to vector<4xf32>
    %3 = vector.shape_cast %2 : vector<4xf32> to vector<4x1xf32>
    %cst_2 = arith.constant dense<0.000000e+00> : vector<4xf32>
    %4 = vector.multi_reduction <add>, %1, %cst_2 [1] : vector<4x256xf32> to vector<4xf32>
    %5 = vector.shape_cast %4 : vector<4xf32> to vector<4x1xf32>
    %cst_3 = arith.constant 3.906250e-03 : f32
    %6 = vector.broadcast %cst_3 : f32 to vector<4x1xf32>
    %7 = arith.mulf %5, %6 : vector<4x1xf32>
    %8 = tpu.iota {dimensions = array<i32: 1>} : vector<4x2xi32>
    %c0_i32 = arith.constant 0 : i32
    %9 = vector.broadcast %c0_i32 : i32 to vector<4x2xi32>
    %10 = arith.cmpi eq, %8, %9 : vector<4x2xi32>
    %11 = vector.shape_cast %3 : vector<4x1xf32> to vector<4x1xf32>
    %12 = vector.broadcast %11 : vector<4x1xf32> to vector<4x2xf32>
    %13 = vector.shape_cast %7 : vector<4x1xf32> to vector<4x1xf32>
    %14 = vector.broadcast %13 : vector<4x1xf32> to vector<4x2xf32>
    %15 = arith.select %10, %12, %14 : vector<4x2xi1>, vector<4x2xf32>
    %c0_4 = arith.constant 0 : index
    %c0_5 = arith.constant 0 : index
    %16 = vector.load %arg2[%c0_4, %c0_5] : memref<2x4xf32, #tpu.memory_space<vmem>>, vector<2x4xf32>
    %cst_6 = arith.constant dense<0.000000e+00> : vector<2x2xf32>
    %17 = tpu.matmul %16, %15, %cst_6 {dimension_numbers = #tpu.dot_dimension_numbers<[1], [0], [0], [1], [0, 0, 1, 1], [], []>} : vector<2x4xf32>, vector<4x2xf32>, vector<2x2xf32> -> vector<2x2xf32>
    %c0_7 = arith.constant 0 : index
    %c0_8 = arith.constant 0 : index
    %18 = vector.load %arg3[%c0_7, %c0_8] : memref<2x1xf32, #tpu.memory_space<vmem>>, vector<2x1xf32>
    %19 = vector.broadcast %18 : vector<2x1xf32> to vector<2x2xf32>
    %20 = arith.addf %17, %19 : vector<2x2xf32>
    %cst_9 = arith.constant 0.000000e+00 : f32
    %21 = vector.broadcast %cst_9 : f32 to vector<2x2xf32>
    %22 = arith.maximumf %20, %21 : vector<2x2xf32>
    %c0_10 = arith.constant 0 : index
    %c0_11 = arith.constant 0 : index
    %23 = vector.load %arg4[%c0_10, %c0_11] : memref<4x2xf32, #tpu.memory_space<vmem>>, vector<4x2xf32>
    %cst_12 = arith.constant dense<0.000000e+00> : vector<4x2xf32>
    %24 = tpu.matmul %23, %22, %cst_12 {dimension_numbers = #tpu.dot_dimension_numbers<[1], [0], [0], [1], [0, 0, 1, 1], [], []>} : vector<4x2xf32>, vector<2x2xf32>, vector<4x2xf32> -> vector<4x2xf32>
    %c0_13 = arith.constant 0 : index
    %c0_14 = arith.constant 0 : index
    %25 = vector.load %arg5[%c0_13, %c0_14] : memref<4x1xf32, #tpu.memory_space<vmem>>, vector<4x1xf32>
    %26 = vector.broadcast %25 : vector<4x1xf32> to vector<4x2xf32>
    %27 = arith.addf %24, %26 : vector<4x2xf32>
    %cst_15 = arith.constant dense<0.000000e+00> : vector<4xf32>
    %28 = vector.multi_reduction <add>, %27, %cst_15 [1] : vector<4x2xf32> to vector<4xf32>
    %29 = vector.shape_cast %28 : vector<4xf32> to vector<4x1xf32>
    %30 = arith.negf %29 : vector<4x1xf32>
    %31 = math.exp %30 : vector<4x1xf32>
    %cst_16 = arith.constant 1.000000e+00 : f32
    %32 = vector.broadcast %cst_16 : f32 to vector<4x1xf32>
    %33 = arith.addf %32, %31 : vector<4x1xf32>
    %34 = arith.divf %32, %33 : vector<4x1xf32>
    %35 = vector.broadcast %34 : vector<4x1xf32> to vector<4x256xf32>
    %36 = arith.mulf %1, %35 : vector<4x256xf32>
    %c0_17 = arith.constant 0 : index
    %c0_18 = arith.constant 0 : index
    %c0_19 = arith.constant 0 : index
    %37 = vector.load %arg6[%c0_17, %c0_18, %c0_19] : memref<1x4x256xf32, #tpu.memory_space<vmem>>, vector<1x4x256xf32>
    %38 = vector.shape_cast %37 : vector<1x4x256xf32> to vector<4x256xf32>
    %39 = vector.shape_cast %36 : vector<4x256xf32> to vector<1x4x256xf32>
    tpu.vector_store %arg6[%c0_17, %c0_18, %c0_19], %39 {strides = array<i32>} : memref<1x4x256xf32, #tpu.memory_space<vmem>>, vector<1x4x256xf32>,
    return
  }
  func.func @transform_0(%arg0: i32) -> (i32, i32, i32) {
    %c0_i32 = arith.constant 0 : i32
    %c0_i32_0 = arith.constant 0 : i32
    %c0_i32_1 = arith.constant 0 : i32
    return %arg0, %c0_i32, %c0_i32_0 : i32, i32, i32
  }
  func.func @transform_1(%arg0: i32) -> (i32, i32) {
    %c0_i32 = arith.constant 0 : i32
    %c0_i32_0 = arith.constant 0 : i32
    %c0_i32_1 = arith.constant 0 : i32
    return %c0_i32, %c0_i32_0 : i32, i32
  }
  func.func @transform_2(%arg0: i32) -> (i32, i32) {
    %c0_i32 = arith.constant 0 : i32
    %c0_i32_0 = arith.constant 0 : i32
    %c0_i32_1 = arith.constant 0 : i32
    return %c0_i32, %c0_i32_0 : i32, i32
  }
  func.func @transform_3(%arg0: i32) -> (i32, i32) {
    %c0_i32 = arith.constant 0 : i32
    %c0_i32_0 = arith.constant 0 : i32
    %c0_i32_1 = arith.constant 0 : i32
    return %c0_i32, %c0_i32_0 : i32, i32
  }
  func.func @transform_4(%arg0: i32) -> (i32, i32) {
    %c0_i32 = arith.constant 0 : i32
    %c0_i32_0 = arith.constant 0 : i32
    %c0_i32_1 = arith.constant 0 : i32
    return %c0_i32, %c0_i32_0 : i32, i32
  }
  func.func @transform_5(%arg0: i32) -> (i32, i32, i32) {
    %c0_i32 = arith.constant 0 : i32
    %c0_i32_0 = arith.constant 0 : i32
    %c0_i32_1 = arith.constant 0 : i32
    return %arg0, %c0_i32, %c0_i32_0 : i32, i32, i32
  }
}

</mosaic_0001>

<bundles_post_ra>
// kernel: tpu_custom_call.1
= control target key start
LH: loop header
LB: loop body
LE: loop exit
PB: predicated region body
PF: predicated region fallthrough
CT: control target
= control target key end

     0   :  { %10 = vsyncpa [#allocation3], 0  ;;  %s952_s0 = inlined_call_operand.hbm [shape: f32[2,4,256], index: 0, kind: input, shape index: {}]   ;;  %s953_s1 = inlined_call_operand.vmem [shape: f32[2,4], index: 1, kind: input, shape index: {}]   ;;  %s954_s2 = inlined_call_operand.vmem [shape: f32[2,1], index: 2, kind: input, shape index: {}]   ;;  %s955_s3 = inlined_call_operand.vmem [shape: f32[4,2], index: 3, kind: input, shape index: {}]   ;;  %s956_s4 = inlined_call_operand.vmem [shape: f32[4,1], index: 4, kind: input, shape index: {}]   ;;  %s957_s5 = inlined_call_operand.hbm [shape: f32[2,4,256], index: 5, kind: output, shape index: {}]  }
   0x1   :  { %12 = vsyncpa [#allocation3 + $0x1], 0 }
   0x2   :  { %13 = vsyncpa [#allocation4], 0 }
   0x3   :  { %15 = vsyncpa [#allocation4 + $0x1], 0  ;;  %s763_s18 = smov 0   ;;  %s765_s19 = smov 0  }
   0x4   :  { %s767_s20 = smov 0   ;;  %s769_s21 = smov 0  }
   0x5 LB: > { %s784_s22 = sadd.s32 4294967295, %s725_s21   ;;  %s537_s23 = sadd.s32 4294967294, %s725_s21   ;;  %s725_s21 = sphi %s769_s21, %s972_s21   ;;  %s721_s20 = sphi %s767_s20, %s971_s20   ;;  %s717_s19 = sphi %s765_s19, %s970_s19   ;;  %s713_s18 = sphi %s763_s18, %s969_s18  }
   0x6   : > { %s788_s24 = sadd.s32 1, %s725_s21   ;;  %s28_s25 = sadd.s32 1, %s721_s20 }
   0x7   : > { %s25_s26 = ssub.s32 %s725_s21, %s788_s24  ;;  %p35_p0 = scmp.ne.s32.totalorder %s721_s20, %s717_s19 }
   0x8   : > { %p26_p1 = scmp.eq.s32.totalorder %s25_s26, 0  ;;  %p36_p2 = scmp.eq.s32.totalorder %s725_s21, 0 }
   0x9   : > { %p41_p3 = scmp.ne.s32.totalorder %s717_s19, %s713_s18  ;;  %p42_p4 = scmp.eq.s32.totalorder %s784_s22, 0 }
   0xa   : > { %s800_s27 = scalar_select %p26_p1, %s721_s20, %s28_s25  }
   0xb   : > { %p802_p5 = por %p36_p2, %p35_p0  ;;  %p806_p6 = por %p42_p4, %p41_p3 }
   0xc   : > { %p149_p7 = scmp.eq.s32.totalorder %s784_s22, 1  ;;  %p155_p8 = scmp.eq.s32.totalorder %s537_s23, 1 }
   0xd   : > { %p584_p10 = scmp.lt.s32.totalorder %s725_s21, 2  ;;  %s187_s7 = sand.u32 1, %s721_s20  }
   0xe   : > { %p813_p11 = por %p149_p7, %p35_p0  ;;  %p817_p12 = por %p155_p8, %p41_p3 }
   0xf   : > { %s556_s8 = sshll.u32 %s725_s21, 7  ;;  %s540_s9 = sshll.u32 %s187_s7, 3 }
  0x10   : > { %s961_s30 = scalar_select %p813_p11, 1, 0 }
  0x11   : > { %s962_s6 = scalar_select %p817_p12, 1, 0 }
  0x12   : > { %s826_s12 = scalar_lea.hbm %s952_s0, %s556_s8  ;;  %s191_s13 = scalar_lea.vmem [#allocation2], %s540_s9 }
  0x13   : > { %s199_s14 = sshll.u32 %s191_s13, 4  ;;  %p830_p13 = pnand %p584_p10, %p802_p5  ;;  %s834_s14 = int_to_ptr.vmem [resolvable:$true] %s199_s14 }
  0x14   : > { %s188_s16 = scalar_lea.sflag [#allocation3], %s187_s7  ;;  %s629_s17 = scalar_lea.hbm %s826_s12, 128 }
  0x15   : > { %p630_p2 = scmp.ne.s32.totalorder %s826_s12, %s629_s17  ;;  %p631_p3 = pneg %p830_p13 }
  0x16   : > { %s634_s26 = scalar_lea.hbm %s952_s0, 256  ;;  %p635_p5 = scmp.lt.u32.totalorder %s826_s12, %s952_s0 }
  0x17   : > { %p632_p4 = pnand %p631_p3, %p630_p2  ;;  %p636_p8 = scmp.lt.u32.totalorder %s634_s26, %s629_s17 }
  0x18   : > { %p638_p9 = scmp.lt.u32.totalorder %s629_s17, %s826_s12 }
  0x19   : > { %p633_p7 = pneg %p632_p4  ;;  %p637_p10 = por %p636_p8, %p635_p5 }
  0x1b   : > { %p639_p0 = por %p638_p9, %p637_p10 }
  0x1d   : > { %p640_p1 = pnand %p639_p0, %p633_p7 }
  0x1f   : > { %643 = shalt.err (!%p640_p1)
}
  0x20   : > { %s644_s7 = scalar_lea.vmem %s834_s14, 128  ;;  %s727_s9 = smov [#allocation2]  }
  0x21   : > { %p645_p2 = scmp.ne.s32.totalorder %s834_s14, %s644_s7  ;;  %s649_s10 = sshll.u32 %s727_s9, 4  ;;  %s650_s10 = int_to_ptr.vmem [resolvable:$false] %s649_s10 }
  0x22   : > { %s651_s11 = scalar_lea.vmem %s650_s10, 256  ;;  %p652_p11 = scmp.lt.s32.totalorder %s834_s14, %s650_s10 }
  0x23   : > { %p647_p4 = pnand %p645_p2, %p631_p3  ;;  %p653_p5 = scmp.lt.s32.totalorder %s651_s11, %s644_s7 }
  0x25   : > { %p648_p12 = pneg %p647_p4  ;;  %p654_p8 = por %p653_p5, %p652_p11 }
  0x27   : > { %p655_p9 = pnand %p654_p8, %p648_p12 }
  0x29   : > { %658 = shalt.err (!%p655_p9)
}
  0x2a   : > { %579 = dma.hbm_to_vmem [thread:$0]  (!%p830_p13), %s826_s12, 128, %s834_s14, %s188_s16  }
  0x2b   : > { %p964_p0 = scmp.lt.s32.totalorder %s725_s21, 3  ;;  %p965_p1 = scmp.ge.s32.totalorder %s725_s21, 1 }
  0x2d   : > { %p205_p3 = pnand %p965_p1, %p964_p0 }
  0x2e   : > { %s868_s13 = sand.u32 (!%p205_p3), 1, %s717_s19  }
  0x2f   : > { %208 = sbr.rel (%p205_p3) target bundleno = 827 (0x33b), region = 40  ;;  %s544_s17 = sshll.u32 (!%p205_p3), %s868_s13, 3 }
  0x30   : > { %s211_s23 = scalar_lea.sflag (!%p205_p3), [#allocation3], %s868_s13  ;;  %s214_s15 = scalar_lea.vmem (!%p205_p3), [#allocation2], %s544_s17 }
  0x36   : > { %704 = dma.done.wait (%p806_p6), %s211_s23, 128  }
  0x37   : > { %706 = vsyncadd (%p806_p6), %s211_s23, 4294967168  ;;  %vm245_vm0 = vcmask 1043456   ;;  %v878_v0 = vld [vmem:[%s214_s15] sm:$0xff]  ;;  %v728_v8 = vmov 0.0   ;;  %vm729_vm1 = vmmov 0   ;;  %v730_v10 = vmov 0  }
  0x38   : > { %v243_v1 = vcombine.high %v878_v0, %v878_v0  ;;  %v251_v2 = vsel %vm245_vm0, %v878_v0, 0.0  ;;  %v246_v4 = vsel %vm245_vm0, %v878_v0, -inf  ;;  %562 = vmatprep.subr.mxu0 %v728_v8  ;;  %567 = vmatprep.subr.mxu1 %v728_v8  ;;  %v262_v9 = vld [vmem:[%s954_s2] sm:$0x3]  ;;  %v257_v12 = vlaneseq  ;;  %s557_s7 = sshll.u32 %s784_s22, 7  ;;  %s240_s9 = scalar_lea.vmem [#allocation5], %s544_s17 }
  0x39   : > { %564 = vmatprep.mubr.msk.f32.mxu0 %vm729_vm1, %v728_v8  ;;  %569 = vmatprep.mubr.msk.f32.mxu1 %vm729_vm1, %v728_v8  ;;  %v347_v11 = vld [vmem:[%s956_s4] sm:$0xf]  ;;  %vm268_vm3 = vcmask 31744   ;;  %vm357_vm4 = vcmask 1041408   ;;  %vm353_vm5 = vcmask 15360   ;;  %vm431_vm6 = vcmask 11264   ;;  %s908_s15 = scalar_lea.hbm %s957_s5, %s557_s7 }
  0x3a   : > { %v252_v3 = vsel %vm245_vm0, %v243_v1, 0.0  ;;  %v247_v5 = vsel %vm245_vm0, %v243_v1, -inf  ;;  %622 = vset.pattern.permute.xlu1 %v730_v10  ;;  %623 = vset.pattern.permute.xlu0 %v730_v10  ;;  %v258_v13 = vand.u32 127, %v257_v12  ;;  %v261_v17 = vld [vmem:[%s953_s1] sm:$0x3]  ;;  %v446_v37 = vshrl.u32 %v257_v12, 7 }
  0x3b   : > { %v253_v6 = vadd.f32 %v252_v3, %v251_v2  ;;  %v248_v7 = vmax.f32 %v246_v4, %v247_v5  ;;  %265 = vperm.xlu1 %622, %v262_v9   ;;  %v346_v24 = vld [vmem:[%s955_s3] sm:$0xf]  ;;  %v731_v34 = vmov 839922192   ;;  %s467_s10 = sshll.u32 %s240_s9, 4  ;;  %s453_s29 = scalar_lea.sflag [#allocation4], %s868_s13  ;;  %s910_s10 = int_to_ptr.vmem [resolvable:$true] %s467_s10 }
  0x3c   : > { %vm259_vm2 = vcmp.eq.s32.totalorder %v258_v13, 0  ;;  %v443_v35 = vunpack.c.l.s4 %v731_v34  ;;  %s659_s12 = scalar_lea.vmem %s910_s10, 128  ;;  %p966_p11 = scmp.ne.s32.totalorder %s961_s30, 0 }
  0x3d   : > { %254 = vadd.xlane.f32.xlu0 %v253_v6  ;;  %p660_p6 = scmp.ne.s32.totalorder %s910_s10, %s659_s12  ;;  %s732_s22 = smov [#allocation5]  }
  0x3e   : > { %v444_v36 = vunpack.c.0.s8 %v443_v35  ;;  %s663_s17 = sshll.u32 %s732_s22, 4  ;;  %s664_s17 = int_to_ptr.vmem [resolvable:$false] %s663_s17 }
  0x3f   : > { %350 = vperm.xlu1 %622, %v347_v11   ;;  %p661_p12 = pnand %p660_p6, %p966_p11  ;;  %s665_s14 = scalar_lea.vmem %s664_s17, 256 }
  0x40   : > { %v447_v38 = vsub.s32 %v444_v36, %v446_v37  ;;  %p666_p7 = scmp.lt.s32.totalorder %s910_s10, %s664_s17  ;;  %p667_p10 = scmp.lt.s32.totalorder %s665_s14, %s659_s12 }
  0x41   : > { %249 = vmax.xlane.f32.xlu0 %v248_v7  ;;  %p662_p13 = pneg %p661_p12 }
  0x42   : > { %p668_p2 = por %p667_p10, %p666_p7 }
  0x44   : > { %p669_p4 = pnand %p668_p2, %p662_p13 }
  0xba   : > { %v266_v19 = vpop.permute.xlu1 %265 }
  0xbe   : > { %v351_v25 = vpop.permute.xlu1 %350 }
  0xca   : > { %v255_v14 = vpop.xlane.xlu0 %254 }
  0xcb   : > { %v256_v15 = vmul.f32 0.00390625, %v255_v14 }
  0xce   : > { %v250_v16 = vpop.xlane.xlu0 %249 }
  0xcf   : > { %v260_v18 = vsel %vm259_vm2, %v250_v16, %v256_v15 }
  0xd0   : > { %563 = vmatpush3.msk.msra.mxu0 %vm245_vm0, %v260_v18 }
  0xd1   : > { %565 = vmatmul.mubr.msk.f32.vlgmr.msra.gmra.mrb[0].mxu0 %vm268_vm3, %v261_v17 }
 0x1a4   : > { %v341_v20 = vpop.f32.mrb[0].mxu0 }
 0x1a5   : > { %v342_v21 = vadd.f32 %v341_v20, %v266_v19  ;;  %v566_v22 = vpop.f32.mrb[1].mxu0 }
 0x1a7   : > { %v345_v23 = vmax.f32 %v342_v21, 0.0 }
 0x1a9   : > { %568 = vmatpush3.msk.msra.mxu1 %vm357_vm4, %v345_v23 }
 0x1aa   : > { %570 = vmatmul.mubr.msk.f32.vlgmr.msra.gmra.mrb[0].mxu1 %vm353_vm5, %v346_v24 }
 0x27d   : > { %v427_v26 = vpop.f32.mrb[0].mxu1 }
 0x27e   : > { %v428_v27 = vadd.f32 %v427_v26, %v351_v25  ;;  %v571_v28 = vpop.f32.mrb[1].mxu1 }
 0x280   : > { %v432_v29 = vsel %vm431_vm6, %v428_v27, 0.0 }
 0x281   : > { %433 = vadd.xlane.f32.xlu0 %v432_v29 }
 0x30e   : > { %v434_v30 = vpop.xlane.xlu0 %433 }
 0x30f   : > { %v550_v31 = vmul.f32 -1.442695, %v434_v30 }
 0x311   : > { %625 = vpow2.f32 %v550_v31 }
 0x31b   : > { %v626_v32 = vpop.eup %625 }
 0x31c   : > { %v438_v33 = vadd.f32 1.0, %v626_v32 }
 0x31e   : > { %627 = vrcp.f32 %v438_v33 }
 0x328   : > { %v628_v39 = vpop.eup %627 }
 0x329   : > { %v448_v40 = vrot.slane %v628_v39, %v447_v38 }
 0x32b   : > { %v450_v41 = vmul.f32 %v448_v40, %v878_v0 }
 0x32d   : > { %451 = vst [vmem:[%s240_s9] sm:$0xff] %v450_v41 }
 0x32e   : > { %672 = shalt.err (!%p669_p4)
}
 0x32f   : > { %s673_s13 = scalar_lea.hbm %s908_s15, 128  ;;  %s677_s26 = scalar_lea.hbm %s957_s5, 256 }
 0x330   : > { %p674_p5 = scmp.ne.s32.totalorder %s908_s15, %s673_s13  ;;  %p678_p0 = scmp.lt.u32.totalorder %s908_s15, %s957_s5 }
 0x331   : > { %p679_p1 = scmp.lt.u32.totalorder %s677_s26, %s673_s13  ;;  %p681_p6 = scmp.lt.u32.totalorder %s673_s13, %s908_s15 }
 0x332   : > { %p675_p8 = pnand %p674_p5, %p966_p11 }
 0x333   : > { %p680_p3 = por %p679_p1, %p678_p0 }
 0x334   : > { %p676_p9 = pneg %p675_p8 }
 0x335   : > { %p682_p12 = por %p681_p6, %p680_p3 }
 0x337   : > { %p683_p13 = pnand %p682_p12, %p676_p9 }
 0x339   : > { %686 = shalt.err (!%p683_p13)
}
 0x33a   : > { %574 = dma.vmem_to_hbm [thread:$0]  (%p966_p11), %s910_s10, 128, %s908_s15, %s453_s29  }
 0x33b PF: > { %s479_s7 = sand.u32 1, %s713_s18   ;;  %p967_p7 = scmp.ne.s32.totalorder %s962_s6, 0 }
 0x33c   : > { %p968_p10 = scmp.ge.s32.totalorder %s725_s21, 2  ;;  %s480_s9 = scalar_lea.sflag [#allocation4], %s479_s7 }
 0x33e   : > { %p581_p2 = pnand %p968_p10, %p967_p7 }
 0x340   : > { %708 = dma.done.wait (!%p581_p2), %s480_s9, 128  }
 0x341   : > { %710 = vsyncadd (!%p581_p2), %s480_s9, 4294967168  ;;  %p18_p4 = scmp.ge.s32.totalorder %s788_s24, 4   ;;  %s969_s18 = smov %s717_s19 }
 0x342   : > { %s970_s19 = smov %s721_s20  ;;  %s971_s20 = smov %s800_s27 }
 0x343   : > { %s972_s21 = smov %s788_s24  ;;  %20 = sbr.rel (!%p18_p4) target bundleno = 5 (0x5), region = 85 }
 0x34a   :  { %485 = vsyncpa [#allocation3], 1 }
 0x34b   :  { %487 = vsyncpa [#allocation3 + $0x1], 1 }
 0x34c   :  { %488 = vsyncpa [#allocation4], 1 }
 0x34d   :  { %490 = vsyncpa [#allocation4 + $0x1], 1 }

</bundles_post_ra>
